<compile_context>
chip_gen: v7x
topology: tpu7x:2x2x1
jax: 0.10.0
libtpu: 0.0.40
codegen_flags: <defaults>
</compile_context>

<pallas_src>
import functools

import jax
import jax.numpy as jnp
from jax.experimental import pallas as pl
from jax.experimental.pallas import tpu as pltpu


# ----------------------------------------------------------------------------
# Kernel
# ----------------------------------------------------------------------------
def channel_kernel(x_ref, wlr_ref, blr_ref, wc_ref, bc_ref, o_ref, acc_ref,
                   *, inv_hw, dim, lane_chunks):
    """Grid = (batch_blocks, hw_blocks); HW is the reduction ('arbitrary') axis.

    x_ref   : (TB, C, THW)     tile of the flattened (zero-padded) input
    wlr_ref : (C, 2C)          folded [W_left | W_right] branch weights
    blr_ref : (1, 2C)          folded [b_left | b_right] branch biases (f32)
    wc_ref  : (C, out_dim)     dense block-diagonal final grouped-conv weight
    bc_ref  : (1, out_dim)     (f32)
    o_ref   : (TB, out_dim)
    acc_ref : (TB, C, 128) f32 lane-partial accumulator (VPU-only steady state)
    """
    h = pl.program_id(1)

    @pl.when(h == 0)
    def _init():
        acc_ref[...] = jnp.zeros_like(acc_ref)

    # Steady state: pure VPU adds of 128-lane chunks (static slices on the
    # ref are free views).  The cross-lane (XLU) reduction is deferred to the
    # finalize block so the streaming loop stays HBM-bound.
    part = x_ref[:, :, 0:128].astype(jnp.float32)
    for k in range(1, lane_chunks):
        part = part + x_ref[:, :, k * 128:(k + 1) * 128].astype(jnp.float32)
    acc_ref[...] += part

    @pl.when(h == pl.num_programs(1) - 1)
    def _finalize():
        # Single lane reduce per batch block; padded zeros contribute nothing.
        pooled = jnp.sum(acc_ref[...], axis=-1) * inv_hw          # (TB, C) f32

        # Both branch MLPs folded + concatenated into one matmul:
        #   [left_pre | right_pre] = pooled @ [W_l | W_r] + [b_l | b_r]
        lr = jnp.dot(pooled.astype(wlr_ref.dtype), wlr_ref[...],
                     preferred_element_type=jnp.float32) + blr_ref[...]
        gate = jax.nn.sigmoid(lr)                                  # (TB, 2C)
        fused = gate[:, :dim] + gate[:, dim:]                      # left + right

        out = jnp.dot(fused.astype(wc_ref.dtype), wc_ref[...],
                      preferred_element_type=jnp.float32) + bc_ref[...]
        o_ref[...] = out.astype(o_ref.dtype)


# ----------------------------------------------------------------------------
# Parameters (PyTorch-layout grouped convs) + folding
# ----------------------------------------------------------------------------
def _grouped_conv_params(key, cin, cout, groups, scale=0.1):
    """Weights/bias for nn.Conv2d(cin, cout, 1, groups=groups): w is
    (cout, cin//groups), b is (cout,)."""
    in_pg = cin // groups
    k_w, k_b = jax.random.split(key)
    w = jax.random.normal(k_w, (cout, in_pg), jnp.float32) * scale
    b = jax.random.normal(k_b, (cout,), jnp.float32) * scale
    return w, b


def _grouped_to_dense(w, cin, groups):
    """Grouped 1x1 conv weight (cout, cin//groups) -> dense (cin, cout)."""
    cout, in_pg = w.shape
    out_pg = cout // groups
    blocks = jnp.transpose(w.reshape(groups, out_pg, in_pg), (0, 2, 1))
    return jax.scipy.linalg.block_diag(*blocks)          # (cin, cout)


def make_channel_params(key, dim, out_dim):
    """Raw (PyTorch layout) params for the five grouped 1x1 convs."""
    assert dim % 4 == 0 and dim % out_dim == 0
    keys = jax.random.split(key, 5)
    return dict(
        convl_1=_grouped_conv_params(keys[0], dim, dim // 4, dim // 4),
        convl_2=_grouped_conv_params(keys[1], dim // 4, dim, dim // 4),
        convr_1=_grouped_conv_params(keys[2], dim, dim * 4, dim),
        convr_2=_grouped_conv_params(keys[3], dim * 4, dim, dim),
        conv=_grouped_conv_params(keys[4], dim, out_dim, out_dim),
    )


def fold_channel_params(params, dim, out_dim):
    """Fold each branch's two linear layers (no nonlinearity between them)
    and concatenate left/right so the kernel does a single (C, 2C) matmul."""
    wl1, bl1 = params["convl_1"]
    wl2, bl2 = params["convl_2"]
    wr1, br1 = params["convr_1"]
    wr2, br2 = params["convr_2"]
    wc, bc = params["conv"]

    Wl1 = _grouped_to_dense(wl1, dim, dim // 4)          # (C, C//4)
    Wl2 = _grouped_to_dense(wl2, dim // 4, dim // 4)     # (C//4, C)
    Wr1 = _grouped_to_dense(wr1, dim, dim)               # (C, 4C)
    Wr2 = _grouped_to_dense(wr2, dim * 4, dim)           # (4C, C)
    Wc = _grouped_to_dense(wc, dim, out_dim)             # (C, out_dim)

    W_left = Wl1 @ Wl2                                   # (C, C)
    b_left = bl1[None, :] @ Wl2 + bl2[None, :]           # (1, C)
    W_right = Wr1 @ Wr2                                  # (C, C)
    b_right = br1[None, :] @ Wr2 + br2[None, :]          # (1, C)

    W_lr = jnp.concatenate([W_left, W_right], axis=1)    # (C, 2C)
    b_lr = jnp.concatenate([b_left, b_right], axis=1)    # (1, 2C)
    return W_lr, b_lr, Wc, bc[None, :]


# ----------------------------------------------------------------------------
# Generation-aware tiling helpers
# ----------------------------------------------------------------------------
def _tpu_generation():
    """Returns (vmem_capacity_bytes, assumed TensorCores per chip).

    Uses VMEM capacity as the generation proxy: 64 MiB -> v7x-class
    (2 TCs, tight VMEM); 128 MiB -> v5e/v6e-class (1 TC)."""
    vmem_cap = 128 * 1024 * 1024
    try:
        vmem_cap = int(pltpu.get_tpu_info().vmem_capacity_bytes)
    except Exception:
        pass
    num_cores = 2 if vmem_cap <= 64 * 1024 * 1024 else 1
    return vmem_cap, num_cores


def _pick_tb_candidates(batch, num_cores):
    """Ordered candidate batch-tile sizes.

    Prefers sublane-aligned (multiple-of-8) divisors of B; on multi-TC chips
    additionally prefers those leaving >= num_cores batch blocks so the
    'parallel' grid axis can be sharded.  Falls back to the full batch (a
    full-extent dim always satisfies the (8,128) block rule)."""
    cap = 128
    divs = [t for t in range(min(batch, cap), 0, -1) if batch % t == 0]
    aligned = [t for t in divs if t % 8 == 0]
    cands = []
    if num_cores > 1:
        cands += [t for t in aligned if batch // t >= num_cores]
    cands += [t for t in aligned if t not in cands]
    if not cands or (batch <= cap and batch not in cands):
        if batch not in cands:
            cands.append(batch)          # full-extent fallback
    return cands


def _pick_thw(hw_pad, tb, c, itemsize, budget):
    """Largest multiple-of-128 divisor of hw_pad whose (tb, C, thw) block
    stays within the per-buffer budget."""
    for mult in range(hw_pad // 128, 0, -1):
        cand = mult * 128
        if hw_pad % cand == 0 and tb * c * cand * itemsize <= budget:
            return cand
    return 128


def _choose_tiles(batch, c, hw_pad, itemsize, is_v7x, num_cores):
    """Pick (tb, thw): shrink tb before thw, keep thw >= 512 when possible."""
    budget = (4 if is_v7x else 8) * 1024 * 1024        # per input buffer
    min_thw = hw_pad if hw_pad < 512 else 512          # >= 2 KiB rows (f32)
    cands = _pick_tb_candidates(batch, num_cores)
    tb = cands[-1]
    for t in cands:
        if t * c * min_thw * itemsize <= budget:
            tb = t
            break
    thw = _pick_thw(hw_pad, tb, c, itemsize, budget)
    return tb, thw


# ----------------------------------------------------------------------------
# Wrapper
# ----------------------------------------------------------------------------
def channel_forward(x, folded_params, out_dim, *, tb=None, thw=None):
    """x: NCHW (B, C, H, W) -> (B, out_dim, 1, 1), matching Channel.forward."""
    B, C, H, W = x.shape
    HW = H * W
    W_lr, b_lr, Wc, bc = folded_params

    vmem_cap, num_cores = _tpu_generation()
    is_v7x = vmem_cap <= 64 * 1024 * 1024
    itemsize = jnp.dtype(x.dtype).itemsize

    # Pad the spatial axis to a multiple of 128 (zeros don't affect the sum;
    # the mean divides by the true HW).
    HW_pad = ((HW + 127) // 128) * 128
    x_flat = x.reshape(B, C, HW)
    if HW_pad != HW:
        x_flat = jnp.pad(x_flat, ((0, 0), (0, 0), (0, HW_pad - HW)))

    auto_tb, auto_thw = _choose_tiles(B, C, HW_pad, itemsize, is_v7x, num_cores)
    tb = auto_tb if tb is None else tb
    thw = auto_thw if thw is None else thw
    assert B % tb == 0
    assert HW_pad % thw == 0 and thw % 128 == 0
    n_hw = HW_pad // thw
    lane_chunks = thw // 128

    # Large configurations: ship the folded weights in bf16 and single-buffer
    # them (they are resident across the whole grid anyway).
    single_buffer_weights = C >= 1024
    if single_buffer_weights:
        W_lr = W_lr.astype(jnp.bfloat16)
        Wc = Wc.astype(jnp.bfloat16)
    b_lr = b_lr.astype(jnp.float32)
    bc = bc.astype(jnp.float32)

    full = lambda b, h: (0, 0)

    def weight_spec(shape):
        if single_buffer_weights:
            return pl.BlockSpec(shape, full, pipeline_mode=pl.Buffered(1))
        return pl.BlockSpec(shape, full)

    if is_v7x:
        # Smaller tiles + faster HBM on v7x: deepen the input pipeline.
        x_spec = pl.BlockSpec((tb, C, thw), lambda b, h: (b, 0, h),
                              pipeline_mode=pl.Buffered(3))
        x_bufs = 3
    else:
        x_spec = pl.BlockSpec((tb, C, thw), lambda b, h: (b, 0, h))
        x_bufs = 2

    # Explicit scoped-VMEM budget using the actual buffered dtypes.
    wbytes = sum(int(a.size) * jnp.dtype(a.dtype).itemsize
                 for a in (W_lr, b_lr, Wc, bc))
    w_bufs = 1 if single_buffer_weights else 2
    vmem_bytes = (x_bufs * tb * C * thw * itemsize       # streamed input
                  + w_bufs * wbytes                      # weights / biases
                  + 4 * tb * C * 128                     # lane-partial scratch
                  + 2 * tb * out_dim * itemsize)         # output tile
    vmem_cap_limit = (48 if is_v7x else 96) * 1024 * 1024
    vmem_limit = max(16 * 1024 * 1024,
                     min(int(1.25 * vmem_bytes) + (2 << 20), vmem_cap_limit))

    kernel = functools.partial(channel_kernel, inv_hw=1.0 / HW, dim=C,
                               lane_chunks=lane_chunks)

    out = pl.pallas_call(
        kernel,
        out_shape=jax.ShapeDtypeStruct((B, out_dim), x.dtype),
        grid=(B // tb, n_hw),
        in_specs=[
            x_spec,                                       # streamed x
            weight_spec((C, 2 * C)),                      # W_lr
            weight_spec((1, 2 * C)),                      # b_lr
            weight_spec((C, out_dim)),                    # Wc
            weight_spec((1, out_dim)),                    # bc
        ],
        out_specs=pl.BlockSpec((tb, out_dim), lambda b, h: (b, 0)),
        scratch_shapes=[pltpu.VMEM((tb, C, 128), jnp.float32)],
        compiler_params=pltpu.CompilerParams(
            dimension_semantics=("parallel", "arbitrary"),
            vmem_limit_bytes=vmem_limit),
    )(x_flat, W_lr, b_lr, Wc, bc)
    return out.reshape(B, out_dim, 1, 1)


# ----------------------------------------------------------------------------
# Plain-JAX reference (unfolded grouped convs, faithful to the PyTorch module)
# ----------------------------------------------------------------------------
def _grouped_conv_apply(x, w, b, groups):
    bsz, cin = x.shape
    cout, in_pg = w.shape
    out_pg = cout // groups
    xg = x.reshape(bsz, groups, in_pg)
    wg = w.reshape(groups, out_pg, in_pg)
    y = jnp.einsum("bgi,goi->bgo", xg, wg).reshape(bsz, cout)
    return y + b[None, :]


def channel_reference(x, params, dim, out_dim):
    pooled = jnp.mean(x, axis=(2, 3))                    # AdaptiveAvgPool2d(1)
    left = _grouped_conv_apply(pooled, *params["convl_1"], dim // 4)
    left = _grouped_conv_apply(left, *params["convl_2"], dim // 4)
    left = jax.nn.sigmoid(left)
    right = _grouped_conv_apply(pooled, *params["convr_1"], dim)
    right = _grouped_conv_apply(right, *params["convr_2"], dim)
    right = jax.nn.sigmoid(right)
    out = _grouped_conv_apply(left + right, *params["conv"], out_dim)
    return out[:, :, None, None]


if __name__ == "__main__":
    key = jax.random.PRNGKey(0)
    k_x, k_p, k_x2 = jax.random.split(key, 3)

    B, dim, out_dim, H, W = 2, 16, 8, 16, 16
    params = make_channel_params(k_p, dim, out_dim)
    folded = fold_channel_params(params, dim, out_dim)

    # Case 1: HW a multiple of 128; thw=128 forces a 2-step spatial reduction
    # so the lane-partial accumulator / pl.when path is exercised.
    x = jax.random.normal(k_x, (B, dim, H, W), jnp.float32)
    y = jax.block_until_ready(channel_forward(x, folded, out_dim, thw=128))
    y_ref = channel_reference(x, params, dim, out_dim)
    assert y.shape == (B, out_dim, 1, 1)
    assert jnp.allclose(y, y_ref, atol=1e-5, rtol=1e-5), float(
        jnp.max(jnp.abs(y - y_ref)))

    # Case 2: odd spatial size (10x10 = 100) exercises the zero-pad-to-128
    # path with the auto-chosen tile sizes.
    x2 = jax.random.normal(k_x2, (B, dim, 10, 10), jnp.float32)
    y2 = jax.block_until_ready(channel_forward(x2, folded, out_dim))
    y2_ref = channel_reference(x2, params, dim, out_dim)
    assert jnp.allclose(y2, y2_ref, atol=1e-5, rtol=1e-5), float(
        jnp.max(jnp.abs(y2 - y2_ref)))

    print("KERNEL_OK")
</pallas_src>

<mosaic_0001>
module attributes {stable_mosaic.version = 11 : i64} {
  func.func @channel_kernel(%arg0: i32, %arg1: i32, %arg2: memref<2x16x128xf32, #tpu.memory_space<vmem>>, %arg3: memref<16x32xf32, #tpu.memory_space<vmem>>, %arg4: memref<1x32xf32, #tpu.memory_space<vmem>>, %arg5: memref<16x8xf32, #tpu.memory_space<vmem>>, %arg6: memref<1x8xf32, #tpu.memory_space<vmem>>, %arg7: memref<2x8xf32, #tpu.memory_space<vmem>>, %arg8: memref<2x16x128xf32, #tpu.memory_space<vmem>>) attributes {dimension_semantics = [#tpu.dimension_semantics<parallel>, #tpu.dimension_semantics<arbitrary>], iteration_bounds = array<i64: 1, 2>, scalar_prefetch = 0 : i64, scratch_operands = 1 : i64, tpu.core_type = #tpu.core_type<tc>, window_params = [{transform_indices = @transform_0, window_bounds = array<i64: 2, 16, 128>}, {pipeline_mode = #tpu.pipeline_mode<synchronous>, transform_indices = @transform_1, window_bounds = array<i64: 16, 32>}, {pipeline_mode = #tpu.pipeline_mode<synchronous>, transform_indices = @transform_2, window_bounds = array<i64: 1, 32>}, {pipeline_mode = #tpu.pipeline_mode<synchronous>, transform_indices = @transform_3, window_bounds = array<i64: 16, 8>}, {pipeline_mode = #tpu.pipeline_mode<synchronous>, transform_indices = @transform_4, window_bounds = array<i64: 1, 8>}, {transform_indices = @transform_5, window_bounds = array<i64: 2, 8>}]} {
    %c0_i32 = arith.constant 0 : i32
    %0 = arith.cmpi eq, %arg1, %c0_i32 : i32
    %1 = arith.extui %0 : i1 to i32
    %c0_i32_0 = arith.constant 0 : i32
    %2 = arith.cmpi ne, %1, %c0_i32_0 : i32
    scf.if %2 {
      %cst = arith.constant 0.000000e+00 : f32
      %10 = vector.broadcast %cst : f32 to vector<2x16x128xf32>
      %c0_10 = arith.constant 0 : index
      %c0_11 = arith.constant 0 : index
      %c0_12 = arith.constant 0 : index
      %11 = vector.load %arg8[%c0_10, %c0_11, %c0_12] : memref<2x16x128xf32, #tpu.memory_space<vmem>>, vector<2x16x128xf32>
      tpu.vector_store %arg8[%c0_10, %c0_11, %c0_12], %10 {strides = array<i32>} : memref<2x16x128xf32, #tpu.memory_space<vmem>>, vector<2x16x128xf32>,
    } else {
    }
    %c0 = arith.constant 0 : index
    %c0_1 = arith.constant 0 : index
    %c0_2 = arith.constant 0 : index
    %3 = vector.load %arg2[%c0, %c0_1, %c0_2] : memref<2x16x128xf32, #tpu.memory_space<vmem>>, vector<2x16x128xf32>
    %c0_3 = arith.constant 0 : index
    %c0_4 = arith.constant 0 : index
    %c0_5 = arith.constant 0 : index
    %4 = vector.load %arg8[%c0_3, %c0_4, %c0_5] : memref<2x16x128xf32, #tpu.memory_space<vmem>>, vector<2x16x128xf32>
    %5 = arith.addf %4, %3 : vector<2x16x128xf32>
    %c0_6 = arith.constant 0 : index
    %c0_7 = arith.constant 0 : index
    %c0_8 = arith.constant 0 : index
    %6 = vector.load %arg8[%c0_6, %c0_7, %c0_8] : memref<2x16x128xf32, #tpu.memory_space<vmem>>, vector<2x16x128xf32>
    tpu.vector_store %arg8[%c0_6, %c0_7, %c0_8], %5 {strides = array<i32>} : memref<2x16x128xf32, #tpu.memory_space<vmem>>, vector<2x16x128xf32>,
    %c1_i32 = arith.constant 1 : i32
    %7 = arith.cmpi eq, %arg1, %c1_i32 : i32
    %8 = arith.extui %7 : i1 to i32
    %c0_i32_9 = arith.constant 0 : i32
    %9 = arith.cmpi ne, %8, %c0_i32_9 : i32
    scf.if %9 {
      %c0_10 = arith.constant 0 : index
      %c0_11 = arith.constant 0 : index
      %c0_12 = arith.constant 0 : index
      %10 = vector.load %arg8[%c0_10, %c0_11, %c0_12] : memref<2x16x128xf32, #tpu.memory_space<vmem>>, vector<2x16x128xf32>
      %cst = arith.constant dense<0.000000e+00> : vector<2x16xf32>
      %11 = vector.multi_reduction <add>, %10, %cst [2] : vector<2x16x128xf32> to vector<2x16xf32>
      %cst_13 = arith.constant 3.906250e-03 : f32
      %12 = vector.broadcast %cst_13 : f32 to vector<2x16xf32>
      %13 = arith.mulf %11, %12 : vector<2x16xf32>
      %c0_14 = arith.constant 0 : index
      %c0_15 = arith.constant 0 : index
      %14 = vector.load %arg3[%c0_14, %c0_15] : memref<16x32xf32, #tpu.memory_space<vmem>>, vector<16x32xf32>
      %cst_16 = arith.constant dense<0.000000e+00> : vector<2x32xf32>
      %15 = tpu.matmul %13, %14, %cst_16 {dimension_numbers = #tpu.dot_dimension_numbers<[1], [0], [0], [1], [0, 0, 1, 1], [], []>} : vector<2x16xf32>, vector<16x32xf32>, vector<2x32xf32> -> vector<2x32xf32>
      %c0_17 = arith.constant 0 : index
      %c0_18 = arith.constant 0 : index
      %16 = vector.load %arg4[%c0_17, %c0_18] : memref<1x32xf32, #tpu.memory_space<vmem>>, vector<1x32xf32>
      %17 = vector.broadcast %16 : vector<1x32xf32> to vector<2x32xf32>
      %18 = arith.addf %15, %17 : vector<2x32xf32>
      %19 = arith.negf %18 : vector<2x32xf32>
      %20 = math.exp %19 : vector<2x32xf32>
      %cst_19 = arith.constant 1.000000e+00 : f32
      %21 = vector.broadcast %cst_19 : f32 to vector<2x32xf32>
      %22 = arith.addf %21, %20 : vector<2x32xf32>
      %23 = arith.divf %21, %22 : vector<2x32xf32>
      %24 = vector.extract_strided_slice %23 {offsets = [0, 0], sizes = [2, 16], strides = [1, 1]} : vector<2x32xf32> to vector<2x16xf32>
      %25 = vector.extract_strided_slice %23 {offsets = [0, 16], sizes = [2, 16], strides = [1, 1]} : vector<2x32xf32> to vector<2x16xf32>
      %26 = arith.addf %24, %25 : vector<2x16xf32>
      %c0_20 = arith.constant 0 : index
      %c0_21 = arith.constant 0 : index
      %27 = vector.load %arg5[%c0_20, %c0_21] : memref<16x8xf32, #tpu.memory_space<vmem>>, vector<16x8xf32>
      %cst_22 = arith.constant dense<0.000000e+00> : vector<2x8xf32>
      %28 = tpu.matmul %26, %27, %cst_22 {dimension_numbers = #tpu.dot_dimension_numbers<[1], [0], [0], [1], [0, 0, 1, 1], [], []>} : vector<2x16xf32>, vector<16x8xf32>, vector<2x8xf32> -> vector<2x8xf32>
      %c0_23 = arith.constant 0 : index
      %c0_24 = arith.constant 0 : index
      %29 = vector.load %arg6[%c0_23, %c0_24] : memref<1x8xf32, #tpu.memory_space<vmem>>, vector<1x8xf32>
      %30 = vector.broadcast %29 : vector<1x8xf32> to vector<2x8xf32>
      %31 = arith.addf %28, %30 : vector<2x8xf32>
      %c0_25 = arith.constant 0 : index
      %c0_26 = arith.constant 0 : index
      %32 = vector.load %arg7[%c0_25, %c0_26] : memref<2x8xf32, #tpu.memory_space<vmem>>, vector<2x8xf32>
      tpu.vector_store %arg7[%c0_25, %c0_26], %31 {strides = array<i32>} : memref<2x8xf32, #tpu.memory_space<vmem>>, vector<2x8xf32>,
    } else {
    }
    return
  }
  func.func @transform_0(%arg0: i32, %arg1: i32) -> (i32, i32, i32) {
    %c0_i32 = arith.constant 0 : i32
    %c0_i32_0 = arith.constant 0 : i32
    return %arg0, %c0_i32, %arg1 : i32, i32, i32
  }
  func.func @transform_1(%arg0: i32, %arg1: i32) -> (i32, i32) {
    %c0_i32 = arith.constant 0 : i32
    %c0_i32_0 = arith.constant 0 : i32
    %c0_i32_1 = arith.constant 0 : i32
    return %c0_i32, %c0_i32_0 : i32, i32
  }
  func.func @transform_2(%arg0: i32, %arg1: i32) -> (i32, i32) {
    %c0_i32 = arith.constant 0 : i32
    %c0_i32_0 = arith.constant 0 : i32
    %c0_i32_1 = arith.constant 0 : i32
    return %c0_i32, %c0_i32_0 : i32, i32
  }
  func.func @transform_3(%arg0: i32, %arg1: i32) -> (i32, i32) {
    %c0_i32 = arith.constant 0 : i32
    %c0_i32_0 = arith.constant 0 : i32
    %c0_i32_1 = arith.constant 0 : i32
    return %c0_i32, %c0_i32_0 : i32, i32
  }
  func.func @transform_4(%arg0: i32, %arg1: i32) -> (i32, i32) {
    %c0_i32 = arith.constant 0 : i32
    %c0_i32_0 = arith.constant 0 : i32
    %c0_i32_1 = arith.constant 0 : i32
    return %c0_i32, %c0_i32_0 : i32, i32
  }
  func.func @transform_5(%arg0: i32, %arg1: i32) -> (i32, i32) {
    %c0_i32 = arith.constant 0 : i32
    %c0_i32_0 = arith.constant 0 : i32
    return %arg0, %c0_i32 : i32, i32
  }
}

</mosaic_0001>

<bundles_post_ra>
// kernel: tpu_custom_call.1
= control target key start
LH: loop header
LB: loop body
LE: loop exit
PB: predicated region body
PF: predicated region fallthrough
CT: control target
= control target key end

     0   :  { %10 = vsyncpa [#allocation4], 0  ;;  %s1017_s0 = inlined_call_operand.hbm [shape: f32[2,16,256], index: 0, kind: input, shape index: {}]   ;;  %s1018_s1 = inlined_call_operand.vmem [shape: f32[16,32], index: 1, kind: input, shape index: {}]   ;;  %s1019_s2 = inlined_call_operand.vmem [shape: f32[1,32], index: 2, kind: input, shape index: {}]   ;;  %s1020_s3 = inlined_call_operand.vmem [shape: f32[16,8], index: 3, kind: input, shape index: {}]   ;;  %s1021_s4 = inlined_call_operand.vmem [shape: f32[1,8], index: 4, kind: input, shape index: {}]   ;;  %s1022_s5 = inlined_call_operand.hbm [shape: f32[2,8], index: 5, kind: output, shape index: {}]  }
   0x1   :  { %12 = vsyncpa [#allocation4 + $0x1], 0 }
   0x2   :  { %13 = vsyncpa [#allocation5], 0  ;;  %s844_s18 = smov 0   ;;  %s846_s19 = smov 0  }
   0x3   :  { %s848_s20 = smov 0   ;;  %s850_s21 = smov 0  }
   0x4   :  { %s852_s22 = smov 0   ;;  %s854_s23 = smov 0  }
   0x5 LB: > { %s574_s24 = sadd.s32 4294967295, %s802_s23   ;;  %s28_s25 = sadd.s32 1, %s798_s22  ;;  %s802_s23 = sphi %s854_s23, %s19_s23   ;;  %s798_s22 = sphi %s852_s22, %s1032_s22   ;;  %s794_s21 = sphi %s850_s21, %s1031_s21   ;;  %s790_s20 = sphi %s848_s20, %s1030_s20   ;;  %s786_s19 = sphi %s846_s19, %s1029_s19   ;;  %s782_s18 = sphi %s844_s18, %s1028_s18  }
   0x6   : > { %p29_p0 = scmp.ge.s32.totalorder %s28_s25, 2  ;;  %s40_s26 = sadd.s32 1, %s790_s20 }
   0x7   : > { %p47_p1 = scmp.ne.s32.totalorder %s790_s20, %s786_s19  ;;  %p48_p2 = scmp.eq.s32.totalorder %s802_s23, 0 }
   0x8   : > { %s1034_s25 = smov (%p29_p0, %s28_s25), 0  ;;  %p53_p4 = scmp.ne.s32.totalorder %s786_s19, %s782_s18 }
   0x9   : > { %p880_p3 = por %p48_p2, %p47_p1  ;;  %s36_s28 = ssub.s32 %s798_s22, %s1034_s25 }
   0xa   : > { %p54_p5 = scmp.eq.s32.totalorder %s574_s24, 0  ;;  %p38_p6 = scmp.eq.s32.totalorder %s36_s28, 0 }
   0xb   : > { %p628_p8 = scmp.lt.s32.totalorder %s802_s23, 2  ;;  %s199_s6 = sand.u32 1, %s790_s20  }
   0xc   : > { %p889_p7 = por %p54_p5, %p53_p4  ;;  %s578_s7 = sshll.u32 %s798_s22, 7 }
   0xd   : > { %s895_s30 = scalar_select %p38_p6, %s790_s20, %s40_s26  }
   0xe   : > { %s577_s8 = sshll.u32 %s199_s6, 5  ;;  %s902_s11 = scalar_lea.hbm %s1017_s0, %s578_s7 }
   0xf   : > { %s203_s12 = scalar_lea.vmem [#allocation3], %s577_s8  ;;  %p906_p9 = pnand %p628_p8, %p880_p3 }
  0x10   : > { %s212_s13 = sshll.u32 %s203_s12, 4  ;;  %s913_s15 = scalar_lea.sflag [#allocation4], %s199_s6  ;;  %s910_s13 = int_to_ptr.vmem [resolvable:$true] %s212_s13 }
  0x11   : > { %s692_s16 = scalar_lea.hbm %s902_s11, 512  ;;  %p694_p12 = pneg %p906_p9 }
  0x12   : > { %p693_p11 = scmp.ne.s32.totalorder %s902_s11, %s692_s16  ;;  %s697_s26 = scalar_lea.hbm %s1017_s0, 1024 }
  0x13   : > { %p698_p1 = scmp.lt.u32.totalorder %s902_s11, %s1017_s0  ;;  %p699_p2 = scmp.lt.u32.totalorder %s697_s26, %s692_s16 }
  0x14   : > { %p695_p13 = pnand %p694_p12, %p693_p11  ;;  %p701_p4 = scmp.lt.u32.totalorder %s692_s16, %s902_s11 }
  0x15   : > { %p700_p3 = por %p699_p2, %p698_p1 }
  0x16   : > { %p696_p0 = pneg %p695_p13 }
  0x17   : > { %p702_p5 = por %p701_p4, %p700_p3 }
  0x19   : > { %p703_p6 = pnand %p702_p5, %p696_p0 }
  0x1b   : > { %706 = shalt.err (!%p703_p6)
}
  0x1c   : > { %s707_s6 = scalar_lea.vmem %s910_s13, 512  ;;  %s804_s7 = smov [#allocation3]  }
  0x1d   : > { %p708_p8 = scmp.ne.s32.totalorder %s910_s13, %s707_s6  ;;  %s712_s8 = sshll.u32 %s804_s7, 4  ;;  %s713_s8 = int_to_ptr.vmem [resolvable:$false] %s712_s8 }
  0x1e   : > { %s714_s9 = scalar_lea.vmem %s713_s8, 1024  ;;  %p715_p10 = scmp.lt.s32.totalorder %s910_s13, %s713_s8 }
  0x1f   : > { %p710_p11 = pnand %p708_p8, %p694_p12  ;;  %p716_p1 = scmp.lt.s32.totalorder %s714_s9, %s707_s6 }
  0x21   : > { %p711_p13 = pneg %p710_p11  ;;  %p717_p2 = por %p716_p1, %p715_p10 }
  0x23   : > { %p718_p3 = pnand %p717_p2, %p711_p13 }
  0x25   : > { %721 = shalt.err (!%p718_p3)
}
  0x26   : > { %s805_s10 = smov 256   ;;  %s806_s12 = smov 128  }
  0x27   : > { %s807_s16 = smov 8   ;;  %p220_p12 = scmp.lt.s32.totalorder %s802_s23, 3 }
  0x28   : > { %627 = dma.hbm_to_vmem [thread:$0]  (!%p906_p9), %s902_s11, 512, %s910_s13, %s913_s15, %s805_s10, %s806_s12, %s807_s16  }
  0x29   : > { %p1026_p0 = scmp.ge.s32.totalorder %s802_s23, 1 }
  0x2b   : > { %p221_p4 = pnand %p1026_p0, %p220_p12 }
  0x2c   : > { %s226_s17 = sand.u32 (!%p221_p4), 1, %s786_s19  }
  0x2d   : > { %224 = sbr.rel (%p221_p4) target bundleno = 824 (0x338), region = 40  ;;  %s580_s18 = sshll.u32 (!%p221_p4), %s226_s17, 5 }
  0x2e   : > { %s227_s26 = scalar_lea.sflag (!%p221_p4), [#allocation4], %s226_s17  ;;  %s230_s27 = scalar_lea.vmem (!%p221_p4), [#allocation3], %s580_s18 }
  0x34   : > { %773 = dma.done.wait (%p889_p7), %s227_s26, 512  }
  0x35   : > { %775 = vsyncadd (%p889_p7), %s227_s26, 4294966784  ;;  %p581_p10 = scmp.ne.s32.totalorder %s794_s21, 0 }
  0x36   : > { %v808_v0 = vmov (!%p581_p10), 0.0  }
  0x37   : > { %256 = sbr.rel (%p581_p10) target bundleno = 62 (0x3e), region = 48  ;;  %257 = vst [vmem:[#allocation2] sm:$0xff] (!%p581_p10), %v808_v0  ;;  %258 = vst [vmem:[#allocation2 + $0x8] sm:$0xff] (!%p581_p10), %v808_v0 }
  0x38   : > { %259 = vst [vmem:[#allocation2 + $0x10] sm:$0xff] (!%p581_p10), %v808_v0  ;;  %260 = vst [vmem:[#allocation2 + $0x18] sm:$0xff] (!%p581_p10), %v808_v0 }
  0x3e PF: > { %v261_v1 = vld [vmem:[%s230_s27] sm:$0xff]  ;;  %v262_v3 = vld [vmem:[%s230_s27 + $0x8] sm:$0xff]  ;;  %v263_v6 = vld [vmem:[%s230_s27 + $0x10] sm:$0xff]  ;;  %p582_p7 = scmp.ne.s32.totalorder %s794_s21, 1 }
  0x3f   : > { %v265_v2 = vld [vmem:[#allocation2] sm:$0xff]  ;;  %v266_v5 = vld [vmem:[#allocation2 + $0x8] sm:$0xff]  ;;  %v267_v7 = vld [vmem:[#allocation2 + $0x10] sm:$0xff]  ;;  %v809_v20 = vmov (!%p582_p7), 0.0|0.0   ;;  %vm810_vm0 = vmmov (!%p582_p7), 0   ;;  %v811_v21 = vmov (!%p582_p7), 0.0   ;;  %v310_v22 = vlaneseq (!%p582_p7) }
  0x40   : > { %v269_v4 = vadd.f32 %v265_v2, %v261_v1  ;;  %v270_v8 = vadd.f32 %v266_v5, %v262_v3  ;;  %v271_v9 = vadd.f32 %v267_v7, %v263_v6  ;;  %v264_v10 = vld [vmem:[%s230_s27 + $0x18] sm:$0xff]  ;;  %280 = sbr.rel (%p582_p7) target bundleno = 799 (0x31f), region = 52  ;;  %v297_v17 = vld [vmem:[%s1018_s1] sm:$0xff] (!%p582_p7)  ;;  %v298_v18 = vld [vmem:[%s1018_s1 + $0x8] sm:$0xff] (!%p582_p7)  ;;  %612 = vmatprep.subr.bf16.mxu0 (!%p582_p7), %v809_v20  ;;  %615 = vmatprep.subr.bf16.mxu1 (!%p582_p7), %v809_v20  ;;  %vm321_vm1 = vcmask (!%p582_p7), 130112   ;;  %s812_s9 = smov (!%p582_p7), 112  }
  0x41   : > { %v268_v11 = vld [vmem:[#allocation2 + $0x18] sm:$0xff]  ;;  %v613_v19 = vpack.c.bf16 (!%p582_p7), %v298_v18, %v297_v17  ;;  %602 = vmatprep.mubr.msk.f32.mxu0 (!%p582_p7), %vm810_vm0, %v811_v21  ;;  %609 = vmatprep.mubr.msk.f32.mxu1 (!%p582_p7), %vm810_vm0, %v811_v21  ;;  %v311_v23 = vand.u32 (!%p582_p7), 127, %v310_v22  ;;  %v313_v24 = vshrl.u32 (!%p582_p7), %v310_v22, 7  ;;  %vm332_vm2 = vcmask (!%p582_p7), 1041409   ;;  %v418_v43 = vld [vmem:[%s1020_s3] sm:$0xff] (!%p582_p7)  ;;  %v419_v44 = vld [vmem:[%s1020_s3 + $0x8] sm:$0xff] (!%p582_p7) }
  0x42   : > { %273 = vst [vmem:[#allocation2] sm:$0xff] %v269_v4  ;;  %v272_v12 = vadd.f32 %v268_v11, %v264_v10  ;;  %274 = vst [vmem:[#allocation2 + $0x8] sm:$0xff] %v270_v8  ;;  %vm334_vm3 = vcmask (!%p582_p7), 130048   ;;  %v616_v45 = vpack.c.bf16 (!%p582_p7), %v419_v44, %v418_v43  ;;  %v583_v46 = vld [vmem:[%s1019_s2] ss:$0 sm:$0xff] (!%p582_p7)  ;;  %vm500_vm4 = vcmask (!%p582_p7), 58368  }
  0x43   : > { %275 = vst [vmem:[#allocation2 + $0x10] sm:$0xff] %v271_v9  ;;  %614 = vmatpush3.bf16.msra.mxu0 (!%p582_p7), %v613_v19  ;;  %v316_v25 = vadd.s32 (!%p582_p7), 4294967288, %v311_v23  ;;  %v314_v28 = vsub.s32 (!%p582_p7), %v311_v23, %v313_v24  ;;  %v586_v56 = vld [vmem:[%s1021_s4] ss:$0 sm:$0xff] (!%p582_p7) }
  0x44   : > { %276 = vst [vmem:[#allocation2 + $0x18] sm:$0xff] %v272_v12  ;;  %617 = vmatpush3.bf16.msra.mxu1 (!%p582_p7), %v616_v45 }
  0x45   : > { %v319_v31 = vsub.s32 (!%p582_p7), %v316_v25, %v313_v24 }
  0x49   : > { %v281_v14 = vld [vmem:[#allocation2] sm:$0xff]  ;;  %v282_v16 = vld [vmem:[#allocation2 + $0x8] sm:$0xff] }
  0x4a   : > { %v283_v13 = vld [vmem:[#allocation2 + $0x10] sm:$0xff]  ;;  %285 = vadd.xlane.f32.xlu0 %v281_v14 }
  0x4b   : > { %289 = vadd.xlane.f32.xlu1 %v283_v13  ;;  %v284_v15 = vld [vmem:[#allocation2 + $0x18] sm:$0xff] }
  0x4e   : > { %287 = vadd.xlane.f32.xlu0 %v282_v16 }
  0x4f   : > { %291 = vadd.xlane.f32.xlu1 %v284_v15 }
  0xd7   : > { %v286_v27 = vpop.xlane.xlu0 %285 }
  0xd8   : > { %v290_v26 = vpop.xlane.xlu1 %289  ;;  %v293_v30 = vmul.f32 0.00390625, %v286_v27 }
  0xd9   : > { %v295_v29 = vmul.f32 0.00390625, %v290_v26 }
  0xda   : > { %v315_v37 = vrot.slane %v293_v30, %v314_v28 }
  0xdb   : > { %v288_v33 = vpop.xlane.xlu0 %287  ;;  %v326_v36 = vrot.slane %v295_v29, %v314_v28 }
  0xdc   : > { %v292_v32 = vpop.xlane.xlu1 %291  ;;  %v294_v35 = vmul.f32 0.00390625, %v288_v33 }
  0xdd   : > { %v296_v34 = vmul.f32 0.00390625, %v292_v32 }
  0xde   : > { %v320_v39 = vrot.slane %v294_v35, %v319_v31 }
  0xdf   : > { %v330_v38 = vrot.slane %v296_v34, %v319_v31 }
  0xe0   : > { %v322_v40 = vsel %vm321_vm1, %v320_v39, %v315_v37 }
  0xe1   : > { %v331_v41 = vsel %vm321_vm1, %v330_v38, %v326_v36 }
  0xe2   : > { %v333_v42 = vsel %vm332_vm2, %v331_v41, %v322_v40 }
  0xe3   : > { %603 = vmatmul.mubr.msk.f32.vlgmr.msra.gmra.mrb[0].mxu0 %vm334_vm3, %v333_v42 }
 0x1b6   : > { %v403_v47 = vpop.f32.mrb[0].mxu0 }
 0x1b7   : > { %v404_v48 = vadd.f32 %v583_v46, %v403_v47  ;;  %v604_v49 = vpop.f32.mrb[1].mxu0 }
 0x1b9   : > { %v585_v50 = vmul.f32 -1.442695, %v404_v48 }
 0x1bb   : > { %688 = vpow2.f32 %v585_v50 }
 0x1c5   : > { %v689_v51 = vpop.eup %688 }
 0x1c6   : > { %v410_v52 = vadd.f32 1.0, %v689_v51 }
 0x1c8   : > { %690 = vrcp.f32 %v410_v52 }
 0x1d2   : > { %v691_v53 = vpop.eup %690 }
 0x1d3   : > { %414 = vrot.lane.b32.xlu0 %v691_v53, %s812_s9 }
 0x245   : > { %v415_v54 = vpop.permute.xlu0 %414 }
 0x246   : > { %v417_v55 = vadd.f32 %v691_v53, %v415_v54 }
 0x248   : > { %610 = vmatmul.mubr.msk.f32.vlgmr.msra.gmra.mrb[0].mxu1 %vm334_vm3, %v417_v55 }
 0x31b   : > { %v496_v57 = vpop.f32.mrb[0].mxu1 }
 0x31c   : > { %v497_v58 = vadd.f32 %v586_v56, %v496_v57  ;;  %v611_v59 = vpop.f32.mrb[1].mxu1 }
 0x31e   : > { %501 = vst.msk [vmem:[#allocation6] sm:$0x3] %vm500_vm4, %v497_v58 }
 0x31f PF: > { %p973_p9 = scmp.eq.s32.totalorder %s574_s24, 1  ;;  %s813_s17 = smov [#allocation6]  }
 0x320   : > { %s511_s18 = sshll.u32 %s813_s17, 4  ;;  %s512_s18 = int_to_ptr.vmem [resolvable:$true] %s511_s18 }
 0x321   : > { %s722_s26 = scalar_lea.vmem %s512_s18, 32  ;;  %p729_p11 = scmp.lt.s32.totalorder %s512_s18, %s512_s18 }
 0x322   : > { %p723_p5 = scmp.ne.s32.totalorder %s512_s18, %s722_s26  ;;  %p730_p13 = scmp.lt.s32.totalorder %s722_s26, %s722_s26 }
 0x324   : > { %p724_p6 = pnand %p723_p5, %p973_p9  ;;  %p731_p1 = por %p730_p13, %p729_p11 }
 0x326   : > { %p725_p8 = pneg %p724_p6 }
 0x328   : > { %p732_p2 = pnand %p731_p1, %p725_p8 }
 0x32a   : > { %735 = shalt.err (!%p732_p2)
}
 0x32b   : > { %s736_s24 = scalar_lea.hbm %s1022_s5, 32 }
 0x32c   : > { %p737_p3 = scmp.ne.s32.totalorder %s1022_s5, %s736_s24  ;;  %p742_p4 = scmp.lt.u32.totalorder %s736_s24, %s1022_s5 }
 0x32e   : > { %p738_p12 = pnand %p737_p3, %p973_p9 }
 0x330   : > { %p739_p0 = pneg %p738_p12 }
 0x332   : > { %p744_p10 = pnand %p742_p4, %p739_p0 }
 0x334   : > { %747 = shalt.err (!%p744_p10)
}
 0x335   : > { %621 = dma.vmem_to_hbm [thread:$0]  (%p973_p9), %s512_s18, 32, %s1022_s5, [#allocation5]  }
 0x336   : > { %777 = dma.done.wait (%p973_p9), [#allocation5], 32  }
 0x337   : > { %779 = vsyncadd (%p973_p9), [#allocation5], 4294967264 }
 0x338 PF: > { %s19_s23 = sadd.s32 1, %s802_s23   ;;  %s1028_s18 = smov %s786_s19 }
 0x339   : > { %p16_p7 = scmp.ge.s32.totalorder %s19_s23, 4   ;;  %s1029_s19 = smov %s790_s20 }
 0x33a   : > { %s1030_s20 = smov %s895_s30  ;;  %s1031_s21 = smov %s798_s22 }
 0x33b   : > { %s1032_s22 = smov %s1034_s25  ;;  %18 = sbr.rel (!%p16_p7) target bundleno = 5 (0x5), region = 86 }
 0x342   :  { %524 = vsyncpa [#allocation4], 1 }
 0x343   :  { %526 = vsyncpa [#allocation4 + $0x1], 1 }
 0x344   :  { %527 = vsyncpa [#allocation5], 1 }
 0x345   :  { %529 = vsyncpa [#allocation5 + $0x1], 1 }

</bundles_post_ra>
